<compile_context>
chip_gen: v5e
topology: v5e:2x2
jax: 0.10.0
libtpu: 0.0.40
codegen_flags: <defaults>
</compile_context>

<pallas_src>
import functools

import jax
import jax.numpy as jnp
from jax.experimental import pallas as pl
from jax.experimental.pallas import tpu as pltpu

_LANES = 512     # lane-dense last dim (multiple of 128 -> long unmasked stores)
_TILE_M = 1024   # rows per block: 1024 * 512 * 4 B = 2 MiB per f32 buffer


def _keep_mask(flat_idx_u32, seed_u32, drop_prob):
    """Stateless Bernoulli(1 - drop_prob) keep-mask from (seed, element index).

    flat_idx_u32 : uint32 array of global element indices
    seed_u32     : uint32 scalar
    Returns bool array: True -> keep element (not dropped).
    """
    h = flat_idx_u32 ^ (seed_u32 * jnp.uint32(0x9E3779B9))
    # 32-bit integer finalizer ("lowbias32") -- good avalanche, pure VPU ops.
    h = h ^ (h >> jnp.uint32(16))
    h = h * jnp.uint32(0x7FEB352D)
    h = h ^ (h >> jnp.uint32(15))
    h = h * jnp.uint32(0x846CA68B)
    h = h ^ (h >> jnp.uint32(16))
    # Compare the low 24 bits against a fixed-point threshold (signed int32
    # compare only, so it lowers cleanly on Mosaic and in interpret mode).
    r = jnp.bitwise_and(h, jnp.uint32(0x00FFFFFF)).astype(jnp.int32)
    threshold = jnp.int32(int(round(float(drop_prob) * (1 << 24))))
    return r >= threshold


def _stable_dropout_kernel(seed_ref, x_ref, o_ref, *, drop_prob):
    """Elementwise dropout on one (tile_m, _LANES) block.

    seed_ref : SMEM (1,) int32        -- PRNG seed
    x_ref    : VMEM (tile_m, _LANES)  -- input tile
    o_ref    : VMEM (tile_m, _LANES)  -- output tile (same dtype as input)
    """
    tm, ln = x_ref.shape
    row0 = pl.program_id(0) * tm
    rows = jax.lax.broadcasted_iota(jnp.int32, (tm, ln), 0) + row0
    cols = jax.lax.broadcasted_iota(jnp.int32, (tm, ln), 1)
    # Global flat element index (fits int32 for tensors < 2^31 elements).
    flat_idx = (rows * ln + cols).astype(jnp.uint32)

    keep = _keep_mask(flat_idx, seed_ref[0].astype(jnp.uint32), drop_prob)

    x = x_ref[...]  # native dtype (bf16 stays bf16 on v6e/v7x)
    scale = jnp.asarray(1.0 / (1.0 - drop_prob), dtype=x.dtype)
    o_ref[...] = jnp.where(keep, x * scale, jnp.zeros((), x.dtype))


def stable_dropout(x: jax.Array, drop_prob: float, seed: int,
                   training: bool = True) -> jax.Array:
    """JAX/Pallas equivalent of StableDropout.forward."""
    if (not training) or drop_prob <= 0.0:
        # StableDropout.forward returns the input unchanged in this case.
        return x

    drop_prob = float(drop_prob)
    orig_shape = x.shape
    total = x.size
    x_flat = jnp.ravel(x)
    seed_arr = jnp.asarray([seed], dtype=jnp.int32)
    scale = jnp.asarray(1.0 / (1.0 - drop_prob), dtype=x.dtype)

    bulk = (total // _LANES) * _LANES
    rows = bulk // _LANES

    pieces = []
    if rows > 0:
        # Full-dim block when the slab is small; otherwise 8-aligned tile rows
        # (Pallas masks the ragged edge block automatically).
        tile_m = _TILE_M if rows > _TILE_M else rows
        x2d = (x_flat if bulk == total else x_flat[:bulk]).reshape(rows, _LANES)

        out2d = pl.pallas_call(
            functools.partial(_stable_dropout_kernel, drop_prob=drop_prob),
            out_shape=jax.ShapeDtypeStruct((rows, _LANES), x.dtype),
            grid=(pl.cdiv(rows, tile_m),),
            in_specs=[
                pl.BlockSpec(memory_space=pltpu.MemorySpace.SMEM),   # seed
                pl.BlockSpec((tile_m, _LANES), lambda i: (i, 0)),    # x tile
            ],
            out_specs=pl.BlockSpec((tile_m, _LANES), lambda i: (i, 0)),
            compiler_params=pltpu.CompilerParams(
                dimension_semantics=("parallel",),      # megacore on v7x
                vmem_limit_bytes=32 * 1024 * 1024,      # headroom; usage ~8 MiB
            ),
        )(seed_arr, x2d)
        pieces.append(out2d.reshape(bulk))

    if bulk != total:
        # Ragged tail (< _LANES elements): same hash/threshold in plain jnp,
        # avoiding a full-tensor pad + slice pass through HBM.
        tail = x_flat[bulk:]
        idx = (jnp.arange(total - bulk, dtype=jnp.int32) + bulk).astype(jnp.uint32)
        keep = _keep_mask(idx, seed_arr[0].astype(jnp.uint32), drop_prob)
        pieces.append(jnp.where(keep, tail * scale, jnp.zeros((), x.dtype)))

    out_flat = pieces[0] if len(pieces) == 1 else jnp.concatenate(pieces)
    return out_flat.reshape(orig_shape)


if __name__ == "__main__":
    key = jax.random.PRNGKey(0)
    # Small NCHW-ish input; the module applies dropout to arbitrary tensors.
    x = jax.random.normal(key, (2, 4, 16, 16), dtype=jnp.float32)

    drop_prob = 0.1
    out_train = jax.block_until_ready(
        stable_dropout(x, drop_prob, seed=1234, training=True))
    out_eval = jax.block_until_ready(
        stable_dropout(x, drop_prob, seed=1234, training=False))

    # Sanity checks on semantics:
    #  - eval mode is identity
    assert jnp.array_equal(out_eval, x)
    #  - every surviving element is exactly x * 1/(1-p); dropped elements are 0
    scale = 1.0 / (1.0 - drop_prob)
    kept = out_train != 0.0
    assert jnp.allclose(jnp.where(kept, out_train, 0.0),
                        jnp.where(kept, x * scale, 0.0),
                        rtol=1e-6, atol=1e-6)
    #  - drop fraction is roughly drop_prob
    drop_frac = 1.0 - float(jnp.mean(kept.astype(jnp.float32)))
    assert 0.0 < drop_frac < 0.3, drop_frac

    print("KERNEL_OK")
</pallas_src>

<mosaic_0001>
module attributes {stable_mosaic.version = 11 : i64} {
  func.func @_stable_dropout_kernel(%arg0: i32, %arg1: memref<1xi32, #tpu.memory_space<smem>>, %arg2: memref<4x512xf32, #tpu.memory_space<vmem>>, %arg3: memref<4x512xf32, #tpu.memory_space<vmem>>) attributes {dimension_semantics = [#tpu.dimension_semantics<parallel>], iteration_bounds = array<i64: 1>, scalar_prefetch = 0 : i64, scratch_operands = 0 : i64, tpu.core_type = #tpu.core_type<tc>, window_params = [{transform_indices = @transform_0, window_bounds = array<i64: 1>}, {transform_indices = @transform_1, window_bounds = array<i64: 4, 512>}, {transform_indices = @transform_2, window_bounds = array<i64: 4, 512>}]} {
    %c4_i32 = arith.constant 4 : i32
    %0 = arith.muli %arg0, %c4_i32 : i32
    %1 = tpu.iota {dimensions = array<i32: 0>} : vector<4x512xi32>
    %2 = vector.broadcast %0 : i32 to vector<4x512xi32>
    %3 = arith.addi %1, %2 : vector<4x512xi32>
    %4 = tpu.iota {dimensions = array<i32: 1>} : vector<4x512xi32>
    %c512_i32 = arith.constant 512 : i32
    %5 = vector.broadcast %c512_i32 : i32 to vector<4x512xi32>
    %6 = arith.muli %3, %5 : vector<4x512xi32>
    %7 = arith.addi %6, %4 : vector<4x512xi32>
    %c0 = arith.constant 0 : index
    %8 = memref.load %arg1[%c0] : memref<1xi32, #tpu.memory_space<smem>>
    %c-1640531527_i32 = arith.constant -1640531527 : i32
    %9 = arith.muli %8, %c-1640531527_i32 : i32
    %10 = vector.broadcast %9 : i32 to vector<4x512xi32>
    %11 = arith.xori %7, %10 : vector<4x512xi32>
    %c16_i32 = arith.constant 16 : i32
    %12 = vector.broadcast %c16_i32 : i32 to vector<4x512xi32>
    %13 = arith.shrui %11, %12 : vector<4x512xi32>
    %14 = arith.xori %11, %13 : vector<4x512xi32>
    %c2146121005_i32 = arith.constant 2146121005 : i32
    %15 = vector.broadcast %c2146121005_i32 : i32 to vector<4x512xi32>
    %16 = arith.muli %14, %15 : vector<4x512xi32>
    %c15_i32 = arith.constant 15 : i32
    %17 = vector.broadcast %c15_i32 : i32 to vector<4x512xi32>
    %18 = arith.shrui %16, %17 : vector<4x512xi32>
    %19 = arith.xori %16, %18 : vector<4x512xi32>
    %c-2073254261_i32 = arith.constant -2073254261 : i32
    %20 = vector.broadcast %c-2073254261_i32 : i32 to vector<4x512xi32>
    %21 = arith.muli %19, %20 : vector<4x512xi32>
    %c16_i32_0 = arith.constant 16 : i32
    %22 = vector.broadcast %c16_i32_0 : i32 to vector<4x512xi32>
    %23 = arith.shrui %21, %22 : vector<4x512xi32>
    %24 = arith.xori %21, %23 : vector<4x512xi32>
    %c16777215_i32 = arith.constant 16777215 : i32
    %25 = vector.broadcast %c16777215_i32 : i32 to vector<4x512xi32>
    %26 = arith.andi %24, %25 : vector<4x512xi32>
    %c1677722_i32 = arith.constant 1677722 : i32
    %27 = vector.broadcast %c1677722_i32 : i32 to vector<4x512xi32>
    %28 = arith.cmpi sge, %26, %27 : vector<4x512xi32>
    %c0_1 = arith.constant 0 : index
    %c0_2 = arith.constant 0 : index
    %29 = vector.load %arg2[%c0_1, %c0_2] : memref<4x512xf32, #tpu.memory_space<vmem>>, vector<4x512xf32>
    %cst = arith.constant 1.11111116 : f32
    %30 = vector.broadcast %cst : f32 to vector<4x512xf32>
    %31 = arith.mulf %29, %30 : vector<4x512xf32>
    %cst_3 = arith.constant 0.000000e+00 : f32
    %32 = vector.broadcast %cst_3 : f32 to vector<4x512xf32>
    %33 = arith.select %28, %31, %32 : vector<4x512xi1>, vector<4x512xf32>
    %c0_4 = arith.constant 0 : index
    %c0_5 = arith.constant 0 : index
    %34 = vector.load %arg3[%c0_4, %c0_5] : memref<4x512xf32, #tpu.memory_space<vmem>>, vector<4x512xf32>
    tpu.vector_store %arg3[%c0_4, %c0_5], %33 {strides = array<i32>} : memref<4x512xf32, #tpu.memory_space<vmem>>, vector<4x512xf32>,
    return
  }
  func.func @transform_0(%arg0: i32) -> i32 {
    %c0_i32 = arith.constant 0 : i32
    %c0_i32_0 = arith.constant 0 : i32
    return %c0_i32 : i32
  }
  func.func @transform_1(%arg0: i32) -> (i32, i32) {
    %c0_i32 = arith.constant 0 : i32
    %c0_i32_0 = arith.constant 0 : i32
    return %arg0, %c0_i32 : i32, i32
  }
  func.func @transform_2(%arg0: i32) -> (i32, i32) {
    %c0_i32 = arith.constant 0 : i32
    %c0_i32_0 = arith.constant 0 : i32
    return %arg0, %c0_i32 : i32, i32
  }
}

</mosaic_0001>

<bundles_post_ra>
// kernel: tpu_custom_call.1
= control target key start
LH: loop header
LB: loop body
LE: loop exit
PB: predicated region body
PF: predicated region fallthrough
CT: control target
= control target key end

     0   :  { %8 = vsyncpa [#allocation4], 0  ;;  %s222_s0 = inlined_call_operand.<no memory space> [shape: s32[1], index: 0, kind: input, shape index: {}]   ;;  %s223_s1 = inlined_call_operand.hbm [shape: f32[4,512], index: 1, kind: input, shape index: {}]   ;;  %s224_s2 = inlined_call_operand.hbm [shape: f32[4,512], index: 2, kind: output, shape index: {}]  }
   0x1   :  { %9 = vsyncpa [#allocation5], 0  ;;  %s17_s11 = sshll.u32 %s223_s1, 4  ;;  %s194_s12 = smov [#allocation3]   ;;  %s18_s11 = int_to_ptr.hbm [resolvable:$true] %s17_s11 }
   0x2   :  { %s19_s13 = sshll.u32 %s194_s12, 4  ;;  %s20_s13 = int_to_ptr.vmem [resolvable:$true] %s19_s13 }
   0x3   :  { %22 = dma.hbm_to_vmem [thread:$0]  %s18_s11, 256, %s20_s13, [#allocation4]  }
   0x4   :  { %190 = dma.done.wait [#allocation4], 256  }
   0x5   :  { %191 = vsyncadd [#allocation4], 4294967040  ;;  %v28_v0 = vlaneseq  ;;  %s43_s16 = smul.u32 2654435769, %s222_s0  ;;  %v89_v12 = vld [vmem:[#allocation3] sm:$0xff]  ;;  %v90_v13 = vld [vmem:[#allocation3 + $0x8] sm:$0xff] }
   0x6   :  { %v91_v14 = vmul.f32 1.1111112, %v89_v12  ;;  %v92_v15 = vmul.f32 1.1111112, %v90_v13  ;;  %vm116_vm0 = vcmask 1043456   ;;  %s195_s0 = smov [#allocation6]  }
   0x7   :  { %v29_v1 = vshrl.u32 %v28_v0, 7  ;;  %v33_v2 = vand.u32 127, %v28_v0  ;;  %v44_v7 = vstv %s43_s16  ;;  %s128_s1 = sshll.u32 %s195_s0, 4  ;;  %s130_s19 = sshll.u32 %s224_s2, 4  ;;  %s129_s1 = int_to_ptr.vmem [resolvable:$true] %s128_s1  ;;  %s131_s19 = int_to_ptr.hbm [resolvable:$true] %s130_s19 }
   0x8   :  { %95 = vst [vmem:[#allocation1] ss:$2 sm:$0xff] %v91_v14 }
   0x9   :  { %v34_v3 = vadd.s32 128, %v33_v2  ;;  %v37_v4 = vmul.u32 512, %v29_v1  ;;  %v35_v5 = vadd.s32 256, %v33_v2  ;;  %v36_v6 = vadd.s32 384, %v33_v2  ;;  %97 = vst [vmem:[#allocation1 + $0x10] ss:$2 sm:$0xff] %v92_v15 }
   0xb   :  { %v38_v8 = vadd.s32 %v37_v4, %v33_v2  ;;  %v39_v9 = vadd.s32 %v37_v4, %v34_v3  ;;  %v40_v10 = vadd.s32 %v37_v4, %v35_v5  ;;  %v41_v11 = vadd.s32 %v37_v4, %v36_v6 }
   0xd   :  { %v45_v16 = vxor.u32 %v44_v7, %v38_v8  ;;  %v46_v17 = vxor.u32 %v44_v7, %v39_v9  ;;  %v47_v18 = vxor.u32 %v44_v7, %v40_v10  ;;  %v48_v19 = vxor.u32 %v44_v7, %v41_v11 }
   0xf   :  { %v49_v20 = vshrl.u32 %v45_v16, 16  ;;  %v50_v21 = vshrl.u32 %v46_v17, 16  ;;  %v51_v22 = vshrl.u32 %v47_v18, 16  ;;  %v52_v23 = vshrl.u32 %v48_v19, 16 }
  0x10   :  { %v99_v50 = vld.sshfl [vmem:[#allocation1 + $0x8] sm:$0xff pattern:$0x75316420]  ;;  %v98_v55 = vld.sshfl [vmem:[#allocation1] sm:$0xff pattern:$0x75316420] }
  0x11   :  { %v53_v24 = vxor.u32 %v49_v20, %v45_v16  ;;  %v54_v25 = vxor.u32 %v50_v21, %v46_v17  ;;  %v55_v26 = vxor.u32 %v51_v22, %v47_v18  ;;  %v56_v27 = vxor.u32 %v52_v23, %v48_v19  ;;  %v101_v59 = vld.sshfl [vmem:[#allocation1 + $0x18] sm:$0xff pattern:$0x75316420]  ;;  %v100_v61 = vld.sshfl [vmem:[#allocation1 + $0x10] sm:$0xff pattern:$0x75316420] }
  0x13   :  { %v57_v28 = vmul.u32 2146121005, %v53_v24  ;;  %v58_v29 = vmul.u32 2146121005, %v54_v25  ;;  %v59_v30 = vmul.u32 2146121005, %v55_v26 }
  0x14   :  { %v60_v31 = vmul.u32 2146121005, %v56_v27 }
  0x15   :  { %v61_v32 = vshrl.u32 %v57_v28, 15  ;;  %v62_v33 = vshrl.u32 %v58_v29, 15  ;;  %v63_v36 = vshrl.u32 %v59_v30, 15 }
  0x16   :  { %v64_v37 = vshrl.u32 %v60_v31, 15 }
  0x17   :  { %v65_v34 = vxor.u32 %v61_v32, %v57_v28  ;;  %v66_v35 = vxor.u32 %v62_v33, %v58_v29  ;;  %v67_v40 = vxor.u32 %v63_v36, %v59_v30 }
  0x18   :  { %v68_v41 = vxor.u32 %v64_v37, %v60_v31 }
  0x19   :  { %v69_v38 = vmul.u32 2221713035, %v65_v34  ;;  %v70_v39 = vmul.u32 2221713035, %v66_v35  ;;  %v71_v44 = vmul.u32 2221713035, %v67_v40 }
  0x1a   :  { %v72_v45 = vmul.u32 2221713035, %v68_v41 }
  0x1b   :  { %v73_v42 = vshrl.u32 %v69_v38, 16  ;;  %v74_v43 = vshrl.u32 %v70_v39, 16  ;;  %v75_v48 = vshrl.u32 %v71_v44, 16 }
  0x1c   :  { %v76_v49 = vshrl.u32 %v72_v45, 16 }
  0x1d   :  { %v77_v46 = vxor.u32 %v73_v42, %v69_v38  ;;  %v78_v47 = vxor.u32 %v74_v43, %v70_v39  ;;  %v79_v53 = vxor.u32 %v75_v48, %v71_v44 }
  0x1e   :  { %v80_v54 = vxor.u32 %v76_v49, %v72_v45 }
  0x1f   :  { %v81_v51 = vand.u32 16777215, %v77_v46  ;;  %v82_v52 = vand.u32 16777215, %v78_v47  ;;  %v83_v56 = vand.u32 16777215, %v79_v53 }
  0x20   :  { %v84_v58 = vand.u32 16777215, %v80_v54 }
  0x21   :  { %vm85_vm1 = vcmp.ge.s32.totalorder %v81_v51, 1677722  ;;  %vm86_vm2 = vcmp.ge.s32.totalorder %v82_v52, 1677722  ;;  %vm87_vm3 = vcmp.ge.s32.totalorder %v83_v56, 1677722 }
  0x22   :  { %v107_v57 = vsel %vm86_vm2, %v99_v50, 0.0  ;;  %v106_v62 = vsel %vm85_vm1, %v98_v55, 0.0  ;;  %vm88_vm4 = vcmp.ge.s32.totalorder %v84_v58, 1677722  ;;  %v108_v2 = vsel %vm87_vm3, %v100_v61, 0.0 }
  0x23   :  { %v114_v60 = vrot.slane %v107_v57, 4  ;;  %v109_v0 = vsel %vm88_vm4, %v101_v59, 0.0 }
  0x24   :  { %v115_v1 = vrot.slane %v109_v0, 4 }
  0x25   :  { %v117_v63 = vsel %vm116_vm0, %v106_v62, %v114_v60 }
  0x26   :  { %121 = vst [vmem:[#allocation6] sm:$0xff] %v117_v63  ;;  %v118_v3 = vsel %vm116_vm0, %v108_v2, %v115_v1 }
  0x27   :  { %122 = vst [vmem:[#allocation6 + $0x8] sm:$0xff] %v118_v3 }
  0x28   :  { %133 = dma.vmem_to_hbm [thread:$0]  %s129_s1, 256, %s131_s19, [#allocation5]  }
  0x29   :  { %192 = dma.done.wait [#allocation5], 256  }
  0x2a   :  { %193 = vsyncadd [#allocation5], 4294967040 }
  0x2b   :  { %138 = vsyncpa [#allocation4], 1 }
  0x2c   :  { %139 = vsyncpa [#allocation5], 1 }

</bundles_post_ra>
